<compile_context>
chip_gen: v5e
topology: v5e:2x2
jax: 0.10.0
libtpu: 0.0.40
codegen_flags: <defaults>
</compile_context>

<pallas_src>
import functools

import jax
import jax.numpy as jnp
from jax.experimental import pallas as pl
from jax.experimental.pallas import tpu as pltpu

LN_EPS = 1e-5
BN_EPS = 1e-5


def _tpu_generation():
    try:
        kind = jax.devices()[0].device_kind.lower()
    except Exception:
        return 6
    for g in (7, 6, 5, 4):
        if f"v{g}" in kind:
            return g
    return 6


_GEN = _tpu_generation()
# v7x: 64 MiB physical VMEM -> leave headroom; v5e/v6e (128 MiB): bigger budget.
VMEM_LIMIT = (40 << 20) if _GEN >= 7 else ((96 << 20) if _GEN >= 5 else (64 << 20))
ROW_TARGET = 256 if _GEN >= 7 else 1024      # row tiles for HBM-bound kernels
BF16_EUP = _GEN >= 6                         # bf16 transcendentals on v6e/v7x
ACT_DTYPE = jnp.bfloat16                     # inter-kernel activation dtype


def _sigmoid(x):
    return 1.0 / (1.0 + jnp.exp(-x))


def _sigmoid_lp(x, low_precision):
    # bf16 EUP (~2x transcendental throughput on v6e/v7x); f32 on older gens.
    if low_precision:
        return _sigmoid(x.astype(jnp.bfloat16)).astype(jnp.float32)
    return _sigmoid(x)


def _silu(x, low_precision=False):
    return x * _sigmoid_lp(x, low_precision)


def _softplus(x):
    # numerically stable: max(x, 0) + log(1 + exp(-|x|))
    return jnp.maximum(x, 0.0) + jnp.log(1.0 + jnp.exp(-jnp.abs(x)))


def _layernorm(x, g, b):
    mu = jnp.mean(x, axis=-1, keepdims=True)
    var = jnp.mean((x - mu) ** 2, axis=-1, keepdims=True)
    return (x - mu) * jax.lax.rsqrt(var + LN_EPS) * g + b


def _pick_tile(n, target, prefer_mult=8):
    """Largest divisor of n that is <= target, preferring multiples of 8."""
    cap = max(1, min(n, target))
    best = None
    for c in range(cap, 0, -1):
        if n % c == 0:
            if c % prefer_mult == 0:
                return c
            if best is None:
                best = c
    return best if best is not None else n


# --------------------------------------------------------------------------
# Feed-forward module (LayerNorm -> Linear -> Swish -> Linear) with residual,
# row-tiled over B*T.  Optional fused final LayerNorm (for the last FFN).
# --------------------------------------------------------------------------
def ffn_kernel(x_ref, g_ref, b_ref, w1_ref, b1_ref, w2_ref, b2_ref, o_ref,
               *, factor, bf16_eup):
    x = x_ref[...].astype(jnp.float32)
    xn = _layernorm(x, g_ref[...], b_ref[...])
    h = jnp.dot(xn.astype(jnp.bfloat16), w1_ref[...],
                preferred_element_type=jnp.float32) + b1_ref[...]
    h = _silu(h, bf16_eup)                                   # Swish
    y = jnp.dot(h.astype(jnp.bfloat16), w2_ref[...],
                preferred_element_type=jnp.float32) + b2_ref[...]
    # TODO(synk): nn.Dropout omitted (identity at inference).
    o_ref[...] = (x + factor * y).astype(o_ref.dtype)


def ffn_ln_kernel(x_ref, g_ref, b_ref, w1_ref, b1_ref, w2_ref, b2_ref,
                  fg_ref, fb_ref, o_ref, *, factor, bf16_eup):
    x = x_ref[...].astype(jnp.float32)
    xn = _layernorm(x, g_ref[...], b_ref[...])
    h = jnp.dot(xn.astype(jnp.bfloat16), w1_ref[...],
                preferred_element_type=jnp.float32) + b1_ref[...]
    h = _silu(h, bf16_eup)
    y = jnp.dot(h.astype(jnp.bfloat16), w2_ref[...],
                preferred_element_type=jnp.float32) + b2_ref[...]
    o_ref[...] = _layernorm(x + factor * y, fg_ref[...], fb_ref[...]).astype(o_ref.dtype)


def ffn_residual(x2d, p, factor, final_ln=None, out_dtype=jnp.float32):
    bt, d = x2d.shape
    bm = _pick_tile(bt, ROW_TARGET)
    row_spec = pl.BlockSpec((bm, d), lambda i: (i, 0))

    def wspec(a):
        return pl.BlockSpec(a.shape, lambda i, n=a.ndim: (0,) * n)

    weights = [p["g"], p["b"], p["w1"], p["b1"], p["w2"], p["b2"]]
    if final_ln is None:
        kernel = functools.partial(ffn_kernel, factor=factor, bf16_eup=BF16_EUP)
    else:
        weights += [final_ln[0], final_ln[1]]
        kernel = functools.partial(ffn_ln_kernel, factor=factor, bf16_eup=BF16_EUP)

    dh = p["w1"].shape[1]
    cost = pl.CostEstimate(
        flops=int(4 * bt * d * dh + 16 * bt * d),
        transcendentals=int(bt * dh),
        bytes_accessed=int(6 * bt * d + 4 * d * dh))
    return pl.pallas_call(
        kernel,
        grid=(bt // bm,),
        in_specs=[row_spec] + [wspec(a) for a in weights],
        out_specs=row_spec,
        out_shape=jax.ShapeDtypeStruct((bt, d), out_dtype),
        compiler_params=pltpu.CompilerParams(
            dimension_semantics=("parallel",),
            vmem_limit_bytes=VMEM_LIMIT),
        cost_estimate=cost,
    )(x2d, *weights)


# --------------------------------------------------------------------------
# Mamba (one direction) — grid (B, T//TB); time axis "arbitrary" with the
# recurrent state h (d_state, d_inner) and the depthwise-conv tail carried in
# VMEM scratch.  `reverse=True` folds ExBimamba's flip([1]) into the kernel
# (anti-causal conv with mirrored taps + reversed scan via the index_map).
# The out-projection weight passed in is already folded with ExBimamba's
# output_proj slice, so this kernel emits the projected (TB, D) contribution.
# --------------------------------------------------------------------------
def mamba_kernel(x_ref, winx_ref, winz_ref, convw_ref, convb_ref,
                 wxdt_ref, wxb_ref, wxc_ref, wdt_ref, bdt_ref,
                 at_ref, dp_ref, wout_ref, o_ref,
                 h_scr, tail_scr, y_scr,
                 *, d_conv, reverse, sub, nt, bf16_eup):
    t_idx = pl.program_id(1)

    @pl.when(t_idx == 0)
    def _():
        h_scr[...] = jnp.zeros_like(h_scr)
        if nt > 1:
            tail_scr[...] = jnp.zeros_like(tail_scr)

    x = x_ref[0]                                         # (TB, D) bf16
    TB = x.shape[0]
    xin = jnp.dot(x, winx_ref[...], preferred_element_type=jnp.float32)  # (TB, d_inner)
    z = jnp.dot(x, winz_ref[...], preferred_element_type=jnp.float32)    # (TB, d_inner)
    d_inner = xin.shape[1]
    K = d_conv

    # Depthwise (anti-)causal conv over time with the tail of the neighbouring
    # tile carried in scratch across grid steps.
    convw = convw_ref[...]                               # (d_conv, d_inner)
    if K > 1:
        if nt > 1:
            tail = tail_scr[...]                         # (K-1, d_inner)
        else:
            tail = jnp.zeros((K - 1, d_inner), jnp.float32)
        if reverse:
            ext = jnp.concatenate([xin, tail], axis=0)   # needs "future" rows
        else:
            ext = jnp.concatenate([tail, xin], axis=0)   # needs "past" rows
    else:
        ext = xin
    xc = jnp.zeros((TB, d_inner), jnp.float32)
    for k in range(K):
        off = (K - 1 - k) if reverse else k
        xc = xc + ext[off:off + TB, :] * convw[k:k + 1, :]
    xc = xc + convb_ref[...]
    xc = _silu(xc, bf16_eup)                             # SiLU

    # Save the conv tail for the next time tile.
    if nt > 1 and K > 1:
        if reverse:
            tail_scr[...] = xin[:K - 1, :]
        else:
            tail_scr[...] = xin[TB - (K - 1):, :]

    xcb = xc.astype(jnp.bfloat16)
    dt_low = jnp.dot(xcb, wxdt_ref[...], preferred_element_type=jnp.float32)
    Bm = jnp.dot(xcb, wxb_ref[...], preferred_element_type=jnp.float32)   # (TB, d_state)
    Cm = jnp.dot(xcb, wxc_ref[...], preferred_element_type=jnp.float32)   # (TB, d_state)
    dt = jnp.dot(dt_low.astype(jnp.bfloat16), wdt_ref[...],
                 preferred_element_type=jnp.float32) + bdt_ref[...]
    dt = _softplus(dt)                                   # (TB, d_inner)

    AT = at_ref[...]                                     # (d_state, d_inner) = A^T
    dtx = dt * xc
    nsub = TB // sub

    def sub_body(ci, h):                                 # h: (d_state, d_inner)
        c = (nsub - 1 - ci) if reverse else ci
        t0 = pl.multiple_of(c * sub, sub)
        dt_c = jax.lax.dynamic_slice_in_dim(dt, t0, sub, 0)
        dtx_c = jax.lax.dynamic_slice_in_dim(dtx, t0, sub, 0)
        B_c = jax.lax.dynamic_slice_in_dim(Bm, t0, sub, 0)
        C_c = jax.lax.dynamic_slice_in_dim(Cm, t0, sub, 0)
        # Hoisted off the serial chain: per-step exp (EUP) and outer product.
        arg = dt_c[:, None, :] * AT[None, :, :]          # (sub, d_state, d_inner)
        if bf16_eup:
            dA = jnp.exp(arg.astype(jnp.bfloat16)).astype(jnp.float32)
        else:
            dA = jnp.exp(arg)
        Bu = B_c[:, :, None] * dtx_c[:, None, :]         # (sub, d_state, d_inner)
        hs = []
        idx = range(sub - 1, -1, -1) if reverse else range(sub)
        for k in idx:                                    # only 2 FMAs on the chain
            h = dA[k] * h + Bu[k]
            hs.append(h)
        if reverse:
            hs = hs[::-1]
        H = jnp.stack(hs, axis=0)                        # (sub, d_state, d_inner)
        # C-contraction done once per chunk (XLU), off the recurrence.
        y_c = jnp.sum(C_c[:, :, None] * H, axis=1)       # (sub, d_inner)
        y_scr[pl.ds(t0, sub), :] = y_c
        return h

    h = jax.lax.fori_loop(0, nsub, sub_body, h_scr[...])
    h_scr[...] = h                                       # carry to next time tile

    y = y_scr[...] + dp_ref[...] * xc                    # D skip connection
    y = y * _silu(z, bf16_eup)                           # gate with SiLU(z)
    o_ref[0] = jnp.dot(y.astype(jnp.bfloat16), wout_ref[...],
                       preferred_element_type=jnp.float32).astype(o_ref.dtype)


def mamba_dir(x, p, *, d_conv, d_state, d_inner, reverse, time_tile=128):
    B, T, D = x.shape
    tb = _pick_tile(T, time_tile)
    if tb < max(d_conv - 1, 1):
        tb = T    # TODO(synk): pad T to a multiple of 8 for prime/awkward T.
    nt = T // tb
    sub = _pick_tile(tb, 8)

    def wspec(a):
        return pl.BlockSpec(a.shape, lambda b, t, n=a.ndim: (0,) * n)

    if reverse:
        x_map = lambda b, t, nt=nt: (b, nt - 1 - t, 0)
    else:
        x_map = lambda b, t: (b, t, 0)

    weights = (p["w_in_x"], p["w_in_z"], p["conv_w"], p["conv_b"],
               p["w_x_dt"], p["w_x_B"], p["w_x_C"], p["w_dt"], p["b_dt"],
               p["AT"], p["Dp"], p["w_out"])
    dt_rank = p["w_x_dt"].shape[1]
    mm_flops = 2 * T * (2 * D * d_inner + d_inner * (dt_rank + 2 * d_state)
                        + dt_rank * d_inner + d_inner * D)
    scan_flops = 8 * T * d_state * d_inner + 2 * T * d_inner * d_conv
    w_bytes = sum(int(a.size * a.dtype.itemsize) for a in weights)
    cost = pl.CostEstimate(
        flops=int(B * (mm_flops + scan_flops)),
        transcendentals=int(B * T * (d_state * d_inner + 4 * d_inner)),
        bytes_accessed=int(4 * B * T * D + w_bytes))

    return pl.pallas_call(
        functools.partial(mamba_kernel, d_conv=d_conv, reverse=reverse,
                          sub=sub, nt=nt, bf16_eup=BF16_EUP),
        grid=(B, nt),
        in_specs=[pl.BlockSpec((1, tb, D), x_map)] + [wspec(a) for a in weights],
        out_specs=pl.BlockSpec((1, tb, D), x_map),
        out_shape=jax.ShapeDtypeStruct((B, T, D), ACT_DTYPE),
        scratch_shapes=[
            pltpu.VMEM((d_state, d_inner), jnp.float32),               # carried h
            pltpu.VMEM((max(d_conv - 1, 1), d_inner), jnp.float32),    # conv tail
            pltpu.VMEM((tb, d_inner), jnp.float32),                    # per-tile y
        ],
        compiler_params=pltpu.CompilerParams(
            dimension_semantics=("parallel", "arbitrary"),
            vmem_limit_bytes=VMEM_LIMIT),
        cost_estimate=cost,
    )(x, *weights)


# --------------------------------------------------------------------------
# ExBimamba residual add (out-projection already folded into the Mamba
# kernels) fused with the Conformer convolution module + its residual.
# One batch element per grid step.
# --------------------------------------------------------------------------
def conv_module_kernel(x1_ref, f_ref, r_ref, pb_ref, lng_ref, lnb_ref,
                       pw1a_ref, pw1g_ref, b1a_ref, b1g_ref, dww_ref,
                       bnsc_ref, bnsh_ref, pw2w_ref, pw2b_ref, o_ref,
                       *, ksize, bf16_eup):
    # x2 = out_proj(cat(fwd, bwd)) + x1, with the matmuls folded into the
    # Mamba out-projections; only the bias + adds remain here.
    x2 = (x1_ref[0].astype(jnp.float32) + f_ref[0].astype(jnp.float32)
          + r_ref[0].astype(jnp.float32) + pb_ref[...])
    T, D = x2.shape

    xn = _layernorm(x2, lng_ref[...], lnb_ref[...]).astype(jnp.bfloat16)
    a = jnp.dot(xn, pw1a_ref[...], preferred_element_type=jnp.float32) + b1a_ref[...]
    g = jnp.dot(xn, pw1g_ref[...], preferred_element_type=jnp.float32) + b1g_ref[...]
    u = a * _sigmoid_lp(g, bf16_eup)                     # GLU (split pointwise conv)

    # Depthwise 'SAME' conv over time: per-tap sublane roll (XLU) + mask, so no
    # sublane-misaligned shifted-slice relayout copies (ksize can be 31).
    pad = (ksize - 1) // 2
    rows = jax.lax.broadcasted_iota(jnp.int32, (T, D), 0)
    dww = dww_ref[...]                                   # (ksize, D)
    y = jnp.zeros((T, D), jnp.float32)
    for k in range(ksize):
        s = k - pad                                      # want u[t + s], 0 outside
        if s == 0:
            shifted = u
        else:
            shifted = pltpu.roll(u, shift=(-s) % T, axis=0)
            shifted = jnp.where((rows + s >= 0) & (rows + s < T), shifted, 0.0)
        y = y + shifted * dww[k:k + 1, :]

    # BatchNorm1d folded to scale/shift (eval / running-stats semantics).
    # TODO(synk): training-mode batch statistics not implemented.
    y = y * bnsc_ref[...] + bnsh_ref[...]
    y = _silu(y, bf16_eup)                               # Swish
    y = jnp.dot(y.astype(jnp.bfloat16), pw2w_ref[...],
                preferred_element_type=jnp.float32) + pw2b_ref[...]
    # TODO(synk): nn.Dropout omitted (identity at inference).
    o_ref[0] = (y + x2).astype(o_ref.dtype)              # residual


def conv_module_residual(x1, fwd, bwd, proj_b, p, *, ksize):
    B, T, D = x1.shape

    def wspec(a):
        return pl.BlockSpec(a.shape, lambda b, n=a.ndim: (0,) * n)

    tensor_spec = pl.BlockSpec((1, T, D), lambda b: (b, 0, 0))
    weights = (proj_b, p["ln_g"], p["ln_b"], p["pw1_wa"], p["pw1_wg"],
               p["pw1_ba"], p["pw1_bg"], p["dw_w"], p["bn_scale"], p["bn_shift"],
               p["pw2_w"], p["pw2_b"])
    w_bytes = sum(int(a.size * a.dtype.itemsize) for a in weights)
    cost = pl.CostEstimate(
        flops=int(B * T * (6 * D * D + 2 * D * ksize + 20 * D)),
        transcendentals=int(2 * B * T * D),
        bytes_accessed=int(8 * B * T * D + w_bytes))
    return pl.pallas_call(
        functools.partial(conv_module_kernel, ksize=ksize, bf16_eup=BF16_EUP),
        grid=(B,),
        in_specs=[tensor_spec, tensor_spec, tensor_spec] + [wspec(a) for a in weights],
        out_specs=tensor_spec,
        out_shape=jax.ShapeDtypeStruct((B, T, D), ACT_DTYPE),
        compiler_params=pltpu.CompilerParams(
            dimension_semantics=("parallel",),
            vmem_limit_bytes=VMEM_LIMIT),
        cost_estimate=cost,
    )(x1, fwd, bwd, *weights)


# --------------------------------------------------------------------------
# Full block.
# --------------------------------------------------------------------------
def conbimamba_block(x, p, *, ksize, d_conv, d_state, d_inner, mamba_time_tile=128):
    B, T, D = x.shape
    f32 = jnp.float32

    # ResidualConn_A: half-step feed-forward (bf16 activation out).
    x1 = ffn_residual(x.reshape(B * T, D), p["ffn_a"], 0.5,
                      out_dtype=ACT_DTYPE).reshape(B, T, D)

    # Fold ExBimamba's output_proj into each Mamba's out_proj (offline matmul).
    wof = (p["mamba_fwd"]["w_out"].astype(f32)
           @ p["out_proj_wf"].astype(f32)).astype(jnp.bfloat16)
    wob = (p["mamba_bwd"]["w_out"].astype(f32)
           @ p["out_proj_wb"].astype(f32)).astype(jnp.bfloat16)

    # ResidualConn_B: ExBimamba (flip folded into the backward kernel).
    fwd = mamba_dir(x1, {**p["mamba_fwd"], "w_out": wof}, d_conv=d_conv,
                    d_state=d_state, d_inner=d_inner, reverse=False,
                    time_tile=mamba_time_tile)
    bwd = mamba_dir(x1, {**p["mamba_bwd"], "w_out": wob}, d_conv=d_conv,
                    d_state=d_state, d_inner=d_inner, reverse=True,
                    time_tile=mamba_time_tile)

    # ResidualConn_B residual + ResidualConn_C conformer conv module, fused.
    x3 = conv_module_residual(x1, fwd, bwd, p["out_proj_b"], p["conv"], ksize=ksize)

    # ResidualConn_D: half-step feed-forward fused with the final LayerNorm.
    out = ffn_residual(x3.reshape(B * T, D), p["ffn_d"], 0.5,
                       final_ln=(p["ln_g"], p["ln_b"]), out_dtype=jnp.float32)
    return out.reshape(B, T, D)


# --------------------------------------------------------------------------
# Deterministic parameter construction (matmul weights stored in bf16).
# NOTE: for peak MXU/lane utilization D, d_inner, 4*D should be multiples of
# 128 (256 on v6e/v7x); demo uses tiny dims for a quick functional run.
# --------------------------------------------------------------------------
def init_params(key, D, *, ffn_mult=4, d_state=16, d_conv=4, expand=2, ksize=7):
    keys = iter(jax.random.split(key, 64))
    bf = jnp.bfloat16

    def nrm(shape, scale=0.02, dtype=jnp.float32):
        return (scale * jax.random.normal(next(keys), shape)).astype(dtype)

    d_inner = expand * D
    dt_rank = -(-D // 16)

    def ffn_params():
        return dict(g=jnp.ones((1, D), jnp.float32), b=jnp.zeros((1, D), jnp.float32),
                    w1=nrm((D, ffn_mult * D), dtype=bf), b1=nrm((1, ffn_mult * D), 0.01),
                    w2=nrm((ffn_mult * D, D), dtype=bf), b2=nrm((1, D), 0.01))

    def mamba_params():
        A_log = jnp.log(jnp.broadcast_to(
            jnp.arange(1, d_state + 1, dtype=jnp.float32), (d_inner, d_state)))
        A = -jnp.exp(A_log)                              # (d_inner, d_state)
        return dict(w_in_x=nrm((D, d_inner), dtype=bf),
                    w_in_z=nrm((D, d_inner), dtype=bf),
                    conv_w=nrm((d_conv, d_inner), 0.1),
                    conv_b=nrm((1, d_inner), 0.1),
                    w_x_dt=nrm((d_inner, dt_rank), dtype=bf),
                    w_x_B=nrm((d_inner, d_state), dtype=bf),
                    w_x_C=nrm((d_inner, d_state), dtype=bf),
                    w_dt=nrm((dt_rank, d_inner), 0.1, dtype=bf),
                    b_dt=nrm((1, d_inner), 0.1),
                    AT=A.T.astype(jnp.float32),          # (d_state, d_inner)
                    Dp=jnp.ones((1, d_inner), jnp.float32),
                    w_out=nrm((d_inner, D), dtype=bf))

    # Conformer conv module (BatchNorm running stats at PyTorch defaults).
    bn_w = jnp.ones((1, D), jnp.float32)
    bn_b = jnp.zeros((1, D), jnp.float32)
    bn_rm = jnp.zeros((1, D), jnp.float32)
    bn_rv = jnp.ones((1, D), jnp.float32)
    bn_scale = bn_w / jnp.sqrt(bn_rv + BN_EPS)
    bn_shift = bn_b - bn_rm * bn_scale
    conv = dict(ln_g=jnp.ones((1, D), jnp.float32), ln_b=jnp.zeros((1, D), jnp.float32),
                pw1_wa=nrm((D, D), dtype=bf), pw1_wg=nrm((D, D), dtype=bf),
                pw1_ba=nrm((1, D), 0.01), pw1_bg=nrm((1, D), 0.01),
                dw_w=nrm((ksize, D), 0.1),
                bn_scale=bn_scale, bn_shift=bn_shift,
                pw2_w=nrm((D, D), dtype=bf), pw2_b=nrm((1, D), 0.01))

    return dict(ffn_a=ffn_params(), ffn_d=ffn_params(),
                mamba_fwd=mamba_params(), mamba_bwd=mamba_params(),
                out_proj_wf=nrm((D, D), dtype=bf),
                out_proj_wb=nrm((D, D), dtype=bf),
                out_proj_b=jnp.zeros((1, D), jnp.float32),
                conv=conv,
                ln_g=jnp.ones((1, D), jnp.float32), ln_b=jnp.zeros((1, D), jnp.float32))


if __name__ == "__main__":
    B, T, D = 2, 16, 32
    ksize = 7           # odd kernel size for 'SAME' padding (default 31, shrunk for T=16)
    d_state, d_conv, expand = 16, 4, 2
    d_inner = expand * D

    key = jax.random.PRNGKey(0)
    kx, kp = jax.random.split(key)
    x = jax.random.normal(kx, (B, T, D), dtype=jnp.float32)
    params = init_params(kp, D, d_state=d_state, d_conv=d_conv,
                         expand=expand, ksize=ksize)

    # mamba_time_tile=8 -> two time tiles at T=16, exercising the carried
    # recurrent-state / conv-tail path in both scan directions.
    out = conbimamba_block(x, params, ksize=ksize, d_conv=d_conv,
                           d_state=d_state, d_inner=d_inner, mamba_time_tile=8)
    out = jax.block_until_ready(out)
    assert out.shape == (B, T, D)
    assert bool(jnp.all(jnp.isfinite(out)))
    print("KERNEL_OK")
</pallas_src>

<mosaic_0001>
module attributes {stable_mosaic.version = 11 : i64} {
  func.func @ffn_kernel(%arg0: i32, %arg1: memref<32x32xf32, #tpu.memory_space<vmem>>, %arg2: memref<1x32xf32, #tpu.memory_space<vmem>>, %arg3: memref<1x32xf32, #tpu.memory_space<vmem>>, %arg4: memref<32x128xbf16, #tpu.memory_space<vmem>>, %arg5: memref<1x128xf32, #tpu.memory_space<vmem>>, %arg6: memref<128x32xbf16, #tpu.memory_space<vmem>>, %arg7: memref<1x32xf32, #tpu.memory_space<vmem>>, %arg8: memref<32x32xbf16, #tpu.memory_space<vmem>>) attributes {dimension_semantics = [#tpu.dimension_semantics<parallel>], iteration_bounds = array<i64: 1>, scalar_prefetch = 0 : i64, scratch_operands = 0 : i64, tpu.core_type = #tpu.core_type<tc>, window_params = [{transform_indices = @transform_0, window_bounds = array<i64: 32, 32>}, {pipeline_mode = #tpu.pipeline_mode<synchronous>, transform_indices = @transform_1, window_bounds = array<i64: 1, 32>}, {pipeline_mode = #tpu.pipeline_mode<synchronous>, transform_indices = @transform_2, window_bounds = array<i64: 1, 32>}, {pipeline_mode = #tpu.pipeline_mode<synchronous>, transform_indices = @transform_3, window_bounds = array<i64: 32, 128>}, {pipeline_mode = #tpu.pipeline_mode<synchronous>, transform_indices = @transform_4, window_bounds = array<i64: 1, 128>}, {pipeline_mode = #tpu.pipeline_mode<synchronous>, transform_indices = @transform_5, window_bounds = array<i64: 128, 32>}, {pipeline_mode = #tpu.pipeline_mode<synchronous>, transform_indices = @transform_6, window_bounds = array<i64: 1, 32>}, {transform_indices = @transform_7, window_bounds = array<i64: 32, 32>}]} {
    %c0 = arith.constant 0 : index
    %c0_0 = arith.constant 0 : index
    %0 = vector.load %arg1[%c0, %c0_0] : memref<32x32xf32, #tpu.memory_space<vmem>>, vector<32x32xf32>
    %c0_1 = arith.constant 0 : index
    %c0_2 = arith.constant 0 : index
    %1 = vector.load %arg2[%c0_1, %c0_2] : memref<1x32xf32, #tpu.memory_space<vmem>>, vector<1x32xf32>
    %c0_3 = arith.constant 0 : index
    %c0_4 = arith.constant 0 : index
    %2 = vector.load %arg3[%c0_3, %c0_4] : memref<1x32xf32, #tpu.memory_space<vmem>>, vector<1x32xf32>
    %cst = arith.constant dense<0.000000e+00> : vector<32xf32>
    %3 = vector.multi_reduction <add>, %0, %cst [1] : vector<32x32xf32> to vector<32xf32>
    %4 = vector.shape_cast %3 : vector<32xf32> to vector<32x1xf32>
    %cst_5 = arith.constant 3.200000e+01 : f32
    %5 = vector.broadcast %cst_5 : f32 to vector<32x1xf32>
    %6 = arith.divf %4, %5 : vector<32x1xf32>
    %7 = vector.broadcast %6 : vector<32x1xf32> to vector<32x32xf32>
    %8 = arith.subf %0, %7 : vector<32x32xf32>
    %9 = arith.mulf %8, %8 : vector<32x32xf32>
    %cst_6 = arith.constant dense<0.000000e+00> : vector<32xf32>
    %10 = vector.multi_reduction <add>, %9, %cst_6 [1] : vector<32x32xf32> to vector<32xf32>
    %11 = vector.shape_cast %10 : vector<32xf32> to vector<32x1xf32>
    %cst_7 = arith.constant 3.200000e+01 : f32
    %12 = vector.broadcast %cst_7 : f32 to vector<32x1xf32>
    %13 = arith.divf %11, %12 : vector<32x1xf32>
    %14 = vector.broadcast %6 : vector<32x1xf32> to vector<32x32xf32>
    %15 = arith.subf %0, %14 : vector<32x32xf32>
    %cst_8 = arith.constant 9.99999974E-6 : f32
    %16 = vector.broadcast %cst_8 : f32 to vector<32x1xf32>
    %17 = arith.addf %13, %16 : vector<32x1xf32>
    %18 = math.rsqrt %17 : vector<32x1xf32>
    %19 = vector.broadcast %18 : vector<32x1xf32> to vector<32x32xf32>
    %20 = arith.mulf %15, %19 : vector<32x32xf32>
    %21 = vector.broadcast %1 : vector<1x32xf32> to vector<32x32xf32>
    %22 = arith.mulf %20, %21 : vector<32x32xf32>
    %23 = vector.broadcast %2 : vector<1x32xf32> to vector<32x32xf32>
    %24 = arith.addf %22, %23 : vector<32x32xf32>
    %25 = arith.truncf %24 : vector<32x32xf32> to vector<32x32xbf16>
    %c0_9 = arith.constant 0 : index
    %c0_10 = arith.constant 0 : index
    %26 = vector.load %arg4[%c0_9, %c0_10] : memref<32x128xbf16, #tpu.memory_space<vmem>>, vector<32x128xbf16>
    %cst_11 = arith.constant dense<0.000000e+00> : vector<32x128xf32>
    %27 = tpu.matmul %25, %26, %cst_11 {dimension_numbers = #tpu.dot_dimension_numbers<[1], [0], [0], [1], [0, 0, 1, 1], [], []>} : vector<32x32xbf16>, vector<32x128xbf16>, vector<32x128xf32> -> vector<32x128xf32>
    %c0_12 = arith.constant 0 : index
    %c0_13 = arith.constant 0 : index
    %28 = vector.load %arg5[%c0_12, %c0_13] : memref<1x128xf32, #tpu.memory_space<vmem>>, vector<1x128xf32>
    %29 = vector.broadcast %28 : vector<1x128xf32> to vector<32x128xf32>
    %30 = arith.addf %27, %29 : vector<32x128xf32>
    %31 = arith.truncf %30 : vector<32x128xf32> to vector<32x128xbf16>
    %cst_14 = arith.constant 0.000000e+00 : bf16
    %32 = vector.broadcast %cst_14 : bf16 to vector<32x128xbf16>
    %33 = arith.subf %32, %31 : vector<32x128xbf16>
    %34 = math.exp %33 : vector<32x128xbf16>
    %cst_15 = arith.constant 1.000000e+00 : bf16
    %35 = vector.broadcast %cst_15 : bf16 to vector<32x128xbf16>
    %36 = arith.addf %35, %34 : vector<32x128xbf16>
    %cst_16 = arith.constant 1.000000e+00 : bf16
    %37 = vector.broadcast %cst_16 : bf16 to vector<32x128xbf16>
    %38 = arith.divf %37, %36 : vector<32x128xbf16>
    %39 = arith.extf %38 : vector<32x128xbf16> to vector<32x128xf32>
    %40 = arith.mulf %30, %39 : vector<32x128xf32>
    %41 = arith.truncf %40 : vector<32x128xf32> to vector<32x128xbf16>
    %c0_17 = arith.constant 0 : index
    %c0_18 = arith.constant 0 : index
    %42 = vector.load %arg6[%c0_17, %c0_18] : memref<128x32xbf16, #tpu.memory_space<vmem>>, vector<128x32xbf16>
    %cst_19 = arith.constant dense<0.000000e+00> : vector<32x32xf32>
    %43 = tpu.matmul %41, %42, %cst_19 {dimension_numbers = #tpu.dot_dimension_numbers<[1], [0], [0], [1], [0, 0, 1, 1], [], []>} : vector<32x128xbf16>, vector<128x32xbf16>, vector<32x32xf32> -> vector<32x32xf32>
    %c0_20 = arith.constant 0 : index
    %c0_21 = arith.constant 0 : index
    %44 = vector.load %arg7[%c0_20, %c0_21] : memref<1x32xf32, #tpu.memory_space<vmem>>, vector<1x32xf32>
    %45 = vector.broadcast %44 : vector<1x32xf32> to vector<32x32xf32>
    %46 = arith.addf %43, %45 : vector<32x32xf32>
    %cst_22 = arith.constant 5.000000e-01 : f32
    %47 = vector.broadcast %cst_22 : f32 to vector<32x32xf32>
    %48 = arith.mulf %47, %46 : vector<32x32xf32>
    %49 = arith.addf %0, %48 : vector<32x32xf32>
    %50 = arith.truncf %49 : vector<32x32xf32> to vector<32x32xbf16>
    %c0_23 = arith.constant 0 : index
    %c0_24 = arith.constant 0 : index
    %51 = vector.load %arg8[%c0_23, %c0_24] : memref<32x32xbf16, #tpu.memory_space<vmem>>, vector<32x32xbf16>
    tpu.vector_store %arg8[%c0_23, %c0_24], %50 {strides = array<i32>} : memref<32x32xbf16, #tpu.memory_space<vmem>>, vector<32x32xbf16>,
    return
  }
  func.func @transform_0(%arg0: i32) -> (i32, i32) {
    %c0_i32 = arith.constant 0 : i32
    %c0_i32_0 = arith.constant 0 : i32
    return %arg0, %c0_i32 : i32, i32
  }
  func.func @transform_1(%arg0: i32) -> (i32, i32) {
    %c0_i32 = arith.constant 0 : i32
    %c0_i32_0 = arith.constant 0 : i32
    %c0_i32_1 = arith.constant 0 : i32
    return %c0_i32, %c0_i32_0 : i32, i32
  }
  func.func @transform_2(%arg0: i32) -> (i32, i32) {
    %c0_i32 = arith.constant 0 : i32
    %c0_i32_0 = arith.constant 0 : i32
    %c0_i32_1 = arith.constant 0 : i32
    return %c0_i32, %c0_i32_0 : i32, i32
  }
  func.func @transform_3(%arg0: i32) -> (i32, i32) {
    %c0_i32 = arith.constant 0 : i32
    %c0_i32_0 = arith.constant 0 : i32
    %c0_i32_1 = arith.constant 0 : i32
    return %c0_i32, %c0_i32_0 : i32, i32
  }
  func.func @transform_4(%arg0: i32) -> (i32, i32) {
    %c0_i32 = arith.constant 0 : i32
    %c0_i32_0 = arith.constant 0 : i32
    %c0_i32_1 = arith.constant 0 : i32
    return %c0_i32, %c0_i32_0 : i32, i32
  }
  func.func @transform_5(%arg0: i32) -> (i32, i32) {
    %c0_i32 = arith.constant 0 : i32
    %c0_i32_0 = arith.constant 0 : i32
    %c0_i32_1 = arith.constant 0 : i32
    return %c0_i32, %c0_i32_0 : i32, i32
  }
  func.func @transform_6(%arg0: i32) -> (i32, i32) {
    %c0_i32 = arith.constant 0 : i32
    %c0_i32_0 = arith.constant 0 : i32
    %c0_i32_1 = arith.constant 0 : i32
    return %c0_i32, %c0_i32_0 : i32, i32
  }
  func.func @transform_7(%arg0: i32) -> (i32, i32) {
    %c0_i32 = arith.constant 0 : i32
    %c0_i32_0 = arith.constant 0 : i32
    return %arg0, %c0_i32 : i32, i32
  }
}

</mosaic_0001>

<bundles_post_ra>
// kernel: tpu_custom_call.1
= control target key start
LH: loop header
LB: loop body
LE: loop exit
PB: predicated region body
PF: predicated region fallthrough
CT: control target
= control target key end

     0   :  { %vm35_vm0 = vcmask 261120   ;;  %s693_s0 = inlined_call_operand.vmem [shape: f32[32,32], index: 0, kind: input, shape index: {}]   ;;  %s694_s1 = inlined_call_operand.vmem [shape: f32[1,32], index: 1, kind: input, shape index: {}]   ;;  %s695_s2 = inlined_call_operand.vmem [shape: f32[1,32], index: 2, kind: input, shape index: {}]   ;;  %s696_s3 = inlined_call_operand.vmem [shape: bf16[32,128], index: 3, kind: input, shape index: {}]   ;;  %s697_s4 = inlined_call_operand.vmem [shape: f32[1,128], index: 4, kind: input, shape index: {}]   ;;  %s698_s5 = inlined_call_operand.vmem [shape: bf16[128,32], index: 5, kind: input, shape index: {}]   ;;  %s699_s6 = inlined_call_operand.vmem [shape: f32[1,32], index: 6, kind: input, shape index: {}]   ;;  %s700_s7 = inlined_call_operand.hbm [shape: bf16[32,32], index: 7, kind: output, shape index: {}]  }
   0x1   :  { %v575_v0 = vld [vmem:[%s693_s0 + $0x10] sm:$0xff]  ;;  %v580_v1 = vld [vmem:[%s693_s0] sm:$0xff] }
   0x2   :  { %v42_v2 = vsel %vm35_vm0, %v575_v0, 0.0  ;;  %v36_v3 = vsel %vm35_vm0, %v580_v1, 0.0 }
   0x3   :  { %43 = vadd.xlane.f32.xlu1 %v42_v2  ;;  %37 = vadd.xlane.f32.xlu0 %v36_v3 }
   0x4   :  { %12 = vsyncpa [#allocation3], 0  ;;  %v589_v4 = vld [vmem:[%s693_s0 + $0x18] sm:$0xff]  ;;  %v594_v5 = vld [vmem:[%s693_s0 + $0x8] sm:$0xff]  ;;  %v527_v8 = vmov 32.0   ;;  %vm375_vm14 = vcmask 257024  }
   0x5   :  { %v45_v6 = vsel %vm35_vm0, %v589_v4, 0.0  ;;  %v39_v7 = vsel %vm35_vm0, %v594_v5, 0.0  ;;  %467 = vrcp.f32 %v527_v8  ;;  %v441_v35 = vld [vmem:[%s696_s3 + $0x8] sm:$0xff]  ;;  %v440_v39 = vld [vmem:[%s696_s3] sm:$0xff]  ;;  %s386_s10 = sshll.u32 %s700_s7, 4  ;;  %s530_s11 = smov 64   ;;  %s387_s10 = int_to_ptr.hbm [resolvable:$true] %s386_s10 }
   0x6   :  { %179 = vmatpush.bf16.msra.mxu0 %v441_v35  ;;  %v449_v35 = vld [vmem:[%s698_s5 + $0x38] sm:$0xff]  ;;  %s531_s3 = smov 4  }
   0x7   :  { %344 = vmatpush.bf16.msra.mxu1 %v449_v35  ;;  %450 = vmatpush.bf16.msra.mxu2 %v449_v35 }
   0xa   :  { %180 = vmatpush.bf16.msra.mxu0 %v440_v39 }
   0xb   :  { %46 = vadd.xlane.f32.xlu1 %v45_v6  ;;  %40 = vadd.xlane.f32.xlu0 %v39_v7  ;;  %v468_v9 = vpop.eup %467 }
   0xc   :  { %v49_v10 = vmul.f32 32.0, %v468_v9  ;;  %vm53_vm1 = vweird.f32 %v468_v9 }
   0xe   :  { %v50_v11 = vsub.f32 1.0, %v49_v10 }
  0x10   :  { %v51_v12 = vmul.f32 %v468_v9, %v50_v11 }
  0x12   :  { %v52_v13 = vadd.f32 %v468_v9, %v51_v12 }
  0x14   :  { %v54_v14 = vsel %vm53_vm1, %v468_v9, %v52_v13  ;;  %v463_v9 = vld [vmem:[%s694_s1] ss:$0 sm:$0xff] }
  0x76   :  { %v44_v15 = vpop.xlane.xlu1 %43  ;;  %v38_v16 = vpop.xlane.xlu0 %37 }
  0x77   :  { %v57_v17 = vmul.f32 %v54_v14, %v44_v15  ;;  %v55_v18 = vmul.f32 %v54_v14, %v38_v16  ;;  %v464_v16 = vld [vmem:[%s695_s2] ss:$0 sm:$0xff] }
  0x79   :  { %v601_v19 = vsub.f32 %v575_v0, %v57_v17  ;;  %v59_v20 = vsub.f32 %v580_v1, %v55_v18 }
  0x7b   :  { %v65_v21 = vmul.f32 %v601_v19, %v601_v19  ;;  %v63_v22 = vmul.f32 %v59_v20, %v59_v20 }
  0x7d   :  { %v73_v23 = vsel %vm35_vm0, %v65_v21, 0.0  ;;  %v67_v24 = vsel %vm35_vm0, %v63_v22, 0.0 }
  0x7e   :  { %v47_v25 = vpop.xlane.xlu1 %46  ;;  %74 = vadd.xlane.f32.xlu0 %v73_v23  ;;  %68 = vadd.xlane.f32.xlu2 %v67_v24  ;;  %v41_v26 = vpop.xlane.xlu0 %40 }
  0x7f   :  { %v58_v27 = vmul.f32 %v54_v14, %v47_v25  ;;  %v56_v28 = vmul.f32 %v54_v14, %v41_v26 }
  0x81   :  { %v609_v29 = vsub.f32 %v589_v4, %v58_v27  ;;  %v60_v30 = vsub.f32 %v594_v5, %v56_v28 }
  0x83   :  { %v66_v31 = vmul.f32 %v609_v29, %v609_v29  ;;  %v64_v32 = vmul.f32 %v60_v30, %v60_v30 }
  0x85   :  { %v76_v33 = vsel %vm35_vm0, %v66_v31, 0.0  ;;  %v70_v34 = vsel %vm35_vm0, %v64_v32, 0.0 }
  0x86   :  { %77 = vadd.xlane.f32.xlu1 %v76_v33  ;;  %71 = vadd.xlane.f32.xlu2 %v70_v34 }
  0xf1   :  { %v69_v36 = vpop.xlane.xlu2 %68  ;;  %v75_v38 = vpop.xlane.xlu0 %74 }
  0xf2   :  { %v79_v37 = vmul.f32 %v69_v36, %v54_v14  ;;  %v81_v41 = vmul.f32 %v75_v38, %v54_v14  ;;  %v465_v36 = vld [vmem:[%s697_s4] ss:$0 sm:$0xff]  ;;  %v447_v38 = vld [vmem:[%s698_s5 + $0x28] sm:$0xff] }
  0xf4   :  { %v83_v40 = vadd.f32 1e-05, %v79_v37  ;;  %v85_v42 = vadd.f32 1e-05, %v81_v41  ;;  %v446_v41 = vld [vmem:[%s698_s5 + $0x20] sm:$0xff] }
  0xf6   :  { %469 = vrsqrt.f32 %v83_v40  ;;  %vm93_vm3 = vweird.f32 %v83_v40  ;;  %vm113_vm10 = vweird.f32 %v85_v42 }
  0xf7   :  { %471 = vrsqrt.f32 %v85_v42 }
  0xf9   :  { %v78_v43 = vpop.xlane.xlu1 %77  ;;  %v72_v44 = vpop.xlane.xlu2 %71 }
  0xfa   :  { %v82_v45 = vmul.f32 %v78_v43, %v54_v14  ;;  %v80_v46 = vmul.f32 %v72_v44, %v54_v14 }
  0xfc   :  { %v470_v47 = vpop.eup %469  ;;  %v86_v48 = vadd.f32 1e-05, %v82_v45  ;;  %v84_v49 = vadd.f32 1e-05, %v80_v46  ;;  %v445_v46 = vld [vmem:[%s698_s5 + $0x18] sm:$0xff] }
  0xfd   :  { %v88_v50 = vmul.f32 %v470_v47, %v83_v40  ;;  %v472_v53 = vpop.eup %471  ;;  %vm94_vm2 = vweird.f32 %v470_v47 }
  0xfe   :  { %473 = vrsqrt.f32 %v86_v48  ;;  %v108_v59 = vmul.f32 %v472_v53, %v85_v42  ;;  %vm95_vm4 = vmor %vm93_vm3, %vm94_vm2  ;;  %vm103_vm6 = vweird.f32 %v84_v49  ;;  %vm123_vm8 = vweird.f32 %v86_v48 }
  0xff   :  { %v89_v51 = vmul.f32 %v470_v47, %v88_v50  ;;  %475 = vrsqrt.f32 %v84_v49  ;;  %vm114_vm11 = vweird.f32 %v472_v53 }
 0x100   :  { %v109_v2 = vmul.f32 %v472_v53, %v108_v59  ;;  %vm115_vm13 = vmor %vm113_vm10, %vm114_vm11 }
 0x101   :  { %v90_v52 = vmul.f32 0.5, %v89_v51  ;;  %v444_v51 = vld [vmem:[%s698_s5 + $0x10] sm:$0xff] }
 0x102   :  { %v110_v10 = vmul.f32 0.5, %v109_v2 }
 0x103   :  { %v91_v54 = vsub.f32 1.5, %v90_v52 }
 0x104   :  { %v474_v55 = vpop.eup %473  ;;  %v111_v17 = vsub.f32 1.5, %v110_v10 }
 0x105   :  { %v476_v56 = vpop.eup %475  ;;  %v118_v57 = vmul.f32 %v474_v55, %v86_v48  ;;  %v92_v58 = vmul.f32 %v470_v47, %v91_v54  ;;  %vm124_vm9 = vweird.f32 %v474_v55 }
 0x106   :  { %v98_v60 = vmul.f32 %v476_v56, %v84_v49  ;;  %vm104_vm5 = vweird.f32 %v476_v56  ;;  %vm125_vm12 = vmor %vm123_vm8, %vm124_vm9  ;;  %v112_v23 = vmul.f32 %v472_v53, %v111_v17 }
 0x107   :  { %v119_v61 = vmul.f32 %v474_v55, %v118_v57  ;;  %v96_v63 = vsel %vm95_vm4, %v470_v47, %v92_v58  ;;  %vm105_vm7 = vmor %vm103_vm6, %vm104_vm5 }
 0x108   :  { %v99_v62 = vmul.f32 %v476_v56, %v98_v60  ;;  %v127_v8 = vmul.f32 %v96_v63, %v59_v20  ;;  %v116_v26 = vsel %vm115_vm13, %v472_v53, %v112_v23 }
 0x109   :  { %v120_v6 = vmul.f32 0.5, %v119_v61  ;;  %v129_v28 = vmul.f32 %v116_v26, %v601_v19  ;;  %v448_v19 = vld [vmem:[%s698_s5 + $0x30] sm:$0xff] }
 0x10a   :  { %v100_v3 = vmul.f32 0.5, %v99_v62  ;;  %v134_v15 = vmul.f32 %v463_v9, %v127_v8  ;;  %345 = vmatpush.bf16.msra.mxu1 %v448_v19  ;;  %451 = vmatpush.bf16.msra.mxu2 %v448_v19  ;;  %v442_v62 = vld [vmem:[%s698_s5] sm:$0xff] }
 0x10b   :  { %v121_v12 = vsub.f32 1.5, %v120_v6  ;;  %v136_v31 = vmul.f32 %v463_v9, %v129_v28 }
 0x10c   :  { %v101_v7 = vsub.f32 1.5, %v100_v3  ;;  %v141_v21 = vadd.f32 %v464_v16, %v134_v15 }
 0x10d   :  { %v122_v20 = vmul.f32 %v474_v55, %v121_v12  ;;  %v143_v33 = vadd.f32 %v464_v16, %v136_v31 }
 0x10e   :  { %v102_v11 = vmul.f32 %v476_v56, %v101_v7  ;;  %346 = vmatpush.bf16.msra.mxu1 %v447_v38  ;;  %452 = vmatpush.bf16.msra.mxu2 %v447_v38 }
 0x10f   :  { %v126_v25 = vsel %vm125_vm12, %v474_v55, %v122_v20 }
 0x110   :  { %v106_v13 = vsel %vm105_vm7, %v476_v56, %v102_v11  ;;  %v130_v27 = vmul.f32 %v126_v25, %v609_v29  ;;  %v443_v56 = vld [vmem:[%s698_s5 + $0x8] sm:$0xff] }
 0x111   :  { %v128_v14 = vmul.f32 %v106_v13, %v60_v30 }
 0x112   :  { %v137_v30 = vmul.f32 %v463_v9, %v130_v27  ;;  %347 = vmatpush.bf16.msra.mxu1 %v446_v41  ;;  %453 = vmatpush.bf16.msra.mxu2 %v446_v41  ;;  %v528_v27 = vmov 1065369472  }
 0x113   :  { %v135_v18 = vmul.f32 %v463_v9, %v128_v14  ;;  %v236_v28 = vunpack.c.h.bf16 %v528_v27 }
 0x114   :  { %v144_v32 = vadd.f32 %v464_v16, %v137_v30 }
 0x115   :  { %v142_v22 = vadd.f32 %v464_v16, %v135_v18 }
 0x116   :  { %v146_v34 = vpack.c.bf16 %v144_v32, %v143_v33  ;;  %348 = vmatpush.bf16.msra.mxu1 %v445_v46  ;;  %454 = vmatpush.bf16.msra.mxu2 %v445_v46  ;;  %v237_v32 = vunpack.c.l.bf16 %v528_v27 }
 0x117   :  { %v145_v24 = vpack.c.bf16 %v142_v22, %v141_v21 }
 0x119   :  { %406 = vmatmul.msk.bf16.vlgmr.msra.gmra.mxu0 %vm35_vm0, %v145_v24 }
 0x11a   :  { %349 = vmatpush.bf16.msra.mxu1 %v444_v51  ;;  %455 = vmatpush.bf16.msra.mxu2 %v444_v51 }
 0x11e   :  { %350 = vmatpush.bf16.msra.mxu1 %v443_v56  ;;  %456 = vmatpush.bf16.msra.mxu2 %v443_v56 }
 0x122   :  { %351 = vmatpush.bf16.msra.mxu1 %v442_v62  ;;  %457 = vmatpush.bf16.msra.mxu2 %v442_v62 }
 0x129   :  { %407 = vmatmul.msk.bf16.gmra.mxu0 %vm35_vm0, %v146_v34 }
 0x196   :  { %v182_v29 = vpop.f32.mrf.mxu0 }
 0x197   :  { %v641_v37 = vadd.f32 %v465_v36, %v182_v29 }
 0x199   :  { %v192_v39 = vpack.c.bf16 %v641_v37, %v641_v37 }
 0x19b   :  { %v196_v40 = vunpack.c.l.bf16 %v192_v39 }
 0x19d   :  { %v200_v42 = vsub.f32 0.0, %v196_v40 }
 0x19e   :  { %v184_v43 = vpop.f32.mrf.mxu0 }
 0x19f   :  { %v204_v44 = vpack.c.bf16 %v200_v42, %v200_v42  ;;  %v651_v45 = vadd.f32 %v465_v36, %v184_v43 }
 0x1a1   :  { %v208_v47 = vunpack.c.l.bf16 %v204_v44  ;;  %v193_v48 = vpack.c.bf16 %v651_v45, %v651_v45 }
 0x1a3   :  { %v212_v49 = vmul.f32 1.442695, %v208_v47  ;;  %v197_v50 = vunpack.c.l.bf16 %v193_v48 }
 0x1a5   :  { %477 = vpow2.f32 %v212_v49  ;;  %v201_v52 = vsub.f32 0.0, %v197_v50 }
 0x1a6   :  { %v187_v53 = vpop.f32.mrf.mxu0 }
 0x1a7   :  { %v205_v54 = vpack.c.bf16 %v201_v52, %v201_v52  ;;  %v661_v55 = vadd.f32 %v465_v36, %v187_v53 }
 0x1a9   :  { %v209_v57 = vunpack.c.l.bf16 %v205_v54  ;;  %v194_v58 = vpack.c.bf16 %v661_v55, %v661_v55 }
 0x1ab   :  { %v478_v59 = vpop.eup %477  ;;  %v214_v60 = vmul.f32 1.442695, %v209_v57  ;;  %v198_v61 = vunpack.c.l.bf16 %v194_v58 }
 0x1ac   :  { %v220_v63 = vpack.c.bf16 %v478_v59, %v478_v59 }
 0x1ad   :  { %479 = vpow2.f32 %v214_v60  ;;  %v202_v2 = vsub.f32 0.0, %v198_v61 }
 0x1ae   :  { %v224_v3 = vunpack.c.l.bf16 %v220_v63  ;;  %v189_v6 = vpop.f32.mrf.mxu0 }
 0x1af   :  { %v206_v7 = vpack.c.bf16 %v202_v2, %v202_v2  ;;  %v671_v8 = vadd.f32 %v465_v36, %v189_v6 }
 0x1b0   :  { %v228_v9 = vadd.f32 1.0, %v224_v3 }
 0x1b1   :  { %v210_v10 = vunpack.c.l.bf16 %v206_v7  ;;  %v195_v11 = vpack.c.bf16 %v671_v8, %v671_v8 }
 0x1b2   :  { %v232_v12 = vpack.c.bf16 %v228_v9, %v228_v9 }
 0x1b3   :  { %v480_v13 = vpop.eup %479  ;;  %v216_v14 = vmul.f32 1.442695, %v210_v10  ;;  %v199_v15 = vunpack.c.l.bf16 %v195_v11 }
 0x1b4   :  { %v238_v16 = vunpack.c.h.bf16 %v232_v12  ;;  %v239_v17 = vunpack.c.l.bf16 %v232_v12  ;;  %v221_v18 = vpack.c.bf16 %v480_v13, %v480_v13 }
 0x1b5   :  { %481 = vpow2.f32 %v216_v14  ;;  %v203_v20 = vsub.f32 0.0, %v199_v15 }
 0x1b6   :  { %483 = vrcp.f32 %v238_v16  ;;  %v225_v21 = vunpack.c.l.bf16 %v221_v18 }
 0x1b7   :  { %485 = vrcp.f32 %v239_v17  ;;  %v207_v22 = vpack.c.bf16 %v203_v20, %v203_v20  ;;  %v466_v17 = vld [vmem:[%s699_s6] ss:$0 sm:$0xff]  ;;  %s529_s6 = smov [#allocation2]  }
 0x1b8   :  { %v229_v23 = vadd.f32 1.0, %v225_v21  ;;  %s384_s8 = sshll.u32 %s529_s6, 4  ;;  %s385_s8 = int_to_ptr.vmem [resolvable:$true] %s384_s8 }
 0x1b9   :  { %v211_v24 = vunpack.c.l.bf16 %v207_v22 }
 0x1ba   :  { %v233_v25 = vpack.c.bf16 %v229_v23, %v229_v23 }
 0x1bb   :  { %v482_v26 = vpop.eup %481  ;;  %v218_v30 = vmul.f32 1.442695, %v211_v24 }
 0x1bc   :  { %v484_v31 = vpop.eup %483  ;;  %v245_v33 = vunpack.c.h.bf16 %v233_v25  ;;  %v246_v34 = vunpack.c.l.bf16 %v233_v25  ;;  %v222_v35 = vpack.c.bf16 %v482_v26, %v482_v26 }
 0x1bd   :  { %v486_v36 = vpop.eup %485  ;;  %487 = vpow2.f32 %v218_v30  ;;  %v241_v29 = vmul.f32 %v484_v31, %v236_v28 }
 0x1be   :  { %489 = vrcp.f32 %v245_v33  ;;  %v226_v19 = vunpack.c.l.bf16 %v222_v35  ;;  %v243_v38 = vmul.f32 %v486_v36, %v237_v32 }
 0x1bf   :  { %491 = vrcp.f32 %v246_v34 }
 0x1c0   :  { %v230_v39 = vadd.f32 1.0, %v226_v19  ;;  %v244_v43 = vpack.c.bf16 %v241_v29, %v243_v38 }
 0x1c2   :  { %v234_v40 = vpack.c.bf16 %v230_v39, %v230_v39  ;;  %v266_v52 = vunpack.c.l.bf16 %v244_v43 }
 0x1c3   :  { %v488_v41 = vpop.eup %487 }
 0x1c4   :  { %v490_v42 = vpop.eup %489  ;;  %v252_v44 = vunpack.c.h.bf16 %v234_v40  ;;  %v253_v46 = vunpack.c.l.bf16 %v234_v40  ;;  %v223_v47 = vpack.c.bf16 %v488_v41, %v488_v41  ;;  %v270_v59 = vmul.f32 %v266_v52, %v641_v37 }
 0x1c5   :  { %v492_v48 = vpop.eup %491  ;;  %v248_v49 = vmul.f32 %v490_v42, %v236_v28 }
 0x1c6   :  { %v250_v50 = vmul.f32 %v492_v48, %v237_v32  ;;  %493 = vrcp.f32 %v252_v44  ;;  %v227_v51 = vunpack.c.l.bf16 %v223_v47 }
 0x1c7   :  { %495 = vrcp.f32 %v253_v46 }
 0x1c8   :  { %v251_v53 = vpack.c.bf16 %v248_v49, %v250_v50  ;;  %v231_v54 = vadd.f32 1.0, %v227_v51 }
 0x1ca   :  { %v267_v56 = vunpack.c.l.bf16 %v251_v53  ;;  %v235_v57 = vpack.c.bf16 %v231_v54, %v231_v54 }
 0x1cc   :  { %v494_v58 = vpop.eup %493  ;;  %v271_v60 = vmul.f32 %v267_v56, %v651_v45  ;;  %v259_v61 = vunpack.c.h.bf16 %v235_v57  ;;  %v260_v62 = vunpack.c.l.bf16 %v235_v57 }
 0x1cd   :  { %v496_v63 = vpop.eup %495  ;;  %v255_v3 = vmul.f32 %v494_v58, %v236_v28 }
 0x1ce   :  { %497 = vrcp.f32 %v259_v61  ;;  %v274_v2 = vpack.c.bf16 %v271_v60, %v270_v59  ;;  %v257_v6 = vmul.f32 %v496_v63, %v237_v32 }
 0x1cf   :  { %499 = vrcp.f32 %v260_v62 }
 0x1d0   :  { %352 = vmatmul.bf16.vlgmr.msra.gmra.mxu1 %v274_v2  ;;  %v258_v9 = vpack.c.bf16 %v255_v3, %v257_v6 }
 0x1d2   :  { %v268_v13 = vunpack.c.l.bf16 %v258_v9 }
 0x1d4   :  { %v498_v7 = vpop.eup %497  ;;  %v272_v37 = vmul.f32 %v268_v13, %v661_v55 }
 0x1d5   :  { %v500_v10 = vpop.eup %499  ;;  %v262_v11 = vmul.f32 %v498_v7, %v236_v28 }
 0x1d6   :  { %v264_v12 = vmul.f32 %v500_v10, %v237_v32 }
 0x1d8   :  { %v265_v14 = vpack.c.bf16 %v262_v11, %v264_v12 }
 0x1da   :  { %v269_v15 = vunpack.c.l.bf16 %v265_v14 }
 0x1dc   :  { %v273_v45 = vmul.f32 %v269_v15, %v671_v8 }
 0x1de   :  { %v275_v16 = vpack.c.bf16 %v273_v45, %v272_v37 }
 0x1e0   :  { %357 = vmatmul.bf16.vlgmr.msra.gmra.mxu2 %v275_v16 }
 0x24d   :  { %v353_v18 = vpop.f32.mrf.mxu1 }
 0x24e   :  { %v354_v20 = vadd.f32 %v466_v17, %v353_v18 }
 0x250   :  { %v363_v21 = vmul.f32 0.5, %v354_v20 }
 0x252   :  { %v367_v22 = vadd.f32 %v363_v21, %v580_v1 }
 0x254   :  { %v371_v23 = vpack.c.bf16 %v367_v22, %v367_v22 }
 0x255   :  { %v355_v24 = vpop.f32.mrf.mxu1 }
 0x256   :  { %376 = vst.msk [vmem:[#allocation2] sm:$0xf] %vm375_vm14, %v371_v23  ;;  %v356_v25 = vadd.f32 %v466_v17, %v355_v24 }
 0x258   :  { %v364_v55 = vmul.f32 0.5, %v356_v25 }
 0x25a   :  { %v368_v8 = vadd.f32 %v364_v55, %v594_v5 }
 0x25c   :  { %v372_v26 = vpack.c.bf16 %v368_v8, %v368_v8 }
 0x25e   :  { %377 = vst.msk [vmem:[#allocation2 + $0x4] sm:$0xf] %vm375_vm14, %v372_v26 }
 0x263   :  { %v358_v27 = vpop.f32.mrf.mxu2 }
 0x264   :  { %v359_v28 = vadd.f32 %v466_v17, %v358_v27 }
 0x266   :  { %v365_v30 = vmul.f32 0.5, %v359_v28 }
 0x268   :  { %v369_v31 = vadd.f32 %v365_v30, %v575_v0 }
 0x26a   :  { %v373_v32 = vpack.c.bf16 %v369_v31, %v369_v31 }
 0x26b   :  { %v360_v33 = vpop.f32.mrf.mxu2 }
 0x26c   :  { %378 = vst.msk [vmem:[#allocation2 + $0x8] sm:$0xf] %vm375_vm14, %v373_v32  ;;  %v361_v1 = vadd.f32 %v466_v17, %v360_v33 }
 0x26e   :  { %v366_v34 = vmul.f32 0.5, %v361_v1 }
 0x270   :  { %v370_v5 = vadd.f32 %v366_v34, %v589_v4 }
 0x272   :  { %v374_v35 = vpack.c.bf16 %v370_v5, %v370_v5 }
 0x274   :  { %379 = vst.msk [vmem:[#allocation2 + $0xc] sm:$0xf] %vm375_vm14, %v374_v35 }
 0x275   :  { %392 = dma.vmem_to_hbm [thread:$0]  %s385_s8, 256, %s387_s10, [#allocation3], %s530_s11, %s530_s11, %s531_s3  }
 0x276   :  { %525 = dma.done.wait [#allocation3], 256  }
 0x277   :  { %526 = vsyncadd [#allocation3], 4294967040 }
 0x278   :  { %397 = vsyncpa [#allocation3], 1 }

</bundles_post_ra>
